<compile_context>
chip_gen: v7x
topology: tpu7x:2x2x1
jax: 0.10.0
libtpu: 0.0.40
codegen_flags: <defaults>
</compile_context>

<pallas_src>
import functools

import numpy as np

import jax
import jax.numpy as jnp
from jax.experimental import pallas as pl
from jax.experimental.pallas import tpu as pltpu


def _nca_kernel(slot_ref,   # (B, n_steps) int32 SMEM: acquire slot per (batch, step), -1 = none
                x_ref,      # (BP*C, H*W)        initial state, BP batches stacked on sublanes
                w0_ref,     # (BP*C, 9)          p0 depthwise taps (tap-transposed, batch-tiled)
                w1_ref,     # (BP*C, 9)          p1 depthwise taps
                wx_ref,     # (BP*hid, BP*C)     block-diag fc0 columns acting on x
                wz1_ref,    # (BP*hid, BP*C)     block-diag fc0 columns acting on z1
                wz2_ref,    # (BP*hid, BP*C)     block-diag fc0 columns acting on z2
                fc1_ref,    # (BP*C, BP*hid)     block-diag fc1 (no bias)
                bias_ref,   # (BP*hid, 1)        fc0 bias + folded conv biases
                time_ref,   # (BP*hid, 1)        fc0 time column (zeros if propagate_time=False)
                out_ref,    # (T, BP*C, H*W)     acquired states (unwritten slots masked outside)
                *, C, H, W, BP, n_steps, activation, propagate_time, roll_matches_jnp):
    HW = H * W
    BPC = BP * C
    blk = pl.program_id(0)

    # Reflect masks, hoisted once at full (BPC, HW) shape (no per-use broadcast in the loop).
    pix = jax.lax.broadcasted_iota(jnp.int32, (BPC, HW), 1)
    col = pix % W
    row = pix // W
    at_c0 = col == 0
    at_cl = col == W - 1
    at_r0 = row == 0
    at_rl = row == H - 1

    w0 = w0_ref[...]
    w1 = w1_ref[...]
    w0t = [w0[:, k:k + 1] for k in range(9)]          # (BPC, 1) taps, hoisted out of the loop
    w1t = [w1[:, k:k + 1] for k in range(9)]
    wx = wx_ref[...]
    wz1 = wz1_ref[...]
    wz2 = wz2_ref[...]
    fc1 = fc1_ref[...]
    bias_v = bias_ref[...]                             # (BP*hid, 1)
    time_v = time_ref[...]                             # (BP*hid, 1)

    def shift(v, k):
        # y[p] = v[(p - k) % HW]   (jnp.roll(v, k) semantics, independent of pltpu.roll's sign)
        amt = (k % HW) if roll_matches_jnp else ((HW - k) % HW)
        return pltpu.roll(v, amt, axis=1)

    def step(s, x):
        # ---- reflect-padded 3x3 depthwise convs from rolled copies of x (XLU shifts) -------
        x_up = shift(x, W)                             # x[p - W]   (row above, wrapped)
        x_dn = shift(x, HW - W)                        # x[p + W]   (row below, wrapped)
        ra = jnp.where(at_r0, x_dn, x_up)              # reflected row r-1
        rb = jnp.where(at_rl, x_up, x_dn)              # reflected row r+1

        z1a = z1b = z2a = z2b = None                   # 4 independent FMA chains
        k = 0
        for v in (ra, x, rb):                          # dr = -1, 0, +1
            lft = shift(v, 1)                          # v[p - 1]
            rgt = shift(v, HW - 1)                     # v[p + 1]
            for patch in (jnp.where(at_c0, rgt, lft),  # dc = -1 (reflect at col 0)
                          v,                           # dc =  0
                          jnp.where(at_cl, lft, rgt)): # dc = +1 (reflect at col W-1)
                p0 = patch * w0t[k]
                p1 = patch * w1t[k]
                if k == 0:
                    z1a, z2a = p0, p1
                elif k == 1:
                    z1b, z2b = p0, p1
                elif k % 2 == 0:
                    z1a, z2a = z1a + p0, z2a + p1
                else:
                    z1b, z2b = z1b + p0, z2b + p1
                k += 1
        z1 = z1a + z1b
        z2 = z2a + z2b

        # ---- per-pixel MLP: fc0 decomposed (no activation-matrix scratch) -------------------
        if propagate_time:
            t_val = s.astype(jnp.float32) * jnp.float32(1.0 / n_steps)   # progress = step/n_steps
            bt = bias_v + t_val * time_v
        else:
            bt = bias_v
        h = (jnp.dot(wx, x, preferred_element_type=jnp.float32)
             + jnp.dot(wz1, z1, preferred_element_type=jnp.float32)
             + jnp.dot(wz2, z2, preferred_element_type=jnp.float32)
             + bt)
        h = jnp.maximum(h, 0.0)
        dx = jnp.dot(fc1, h, preferred_element_type=jnp.float32)
        if activation == 'sigmoid':
            dx = jax.nn.sigmoid(dx)
        # TODO(synk): fire_rate < 1 stochastic masking uses host-side torch.rand; not ported.
        x_new = x + dx

        # ---- acquire: one predicated dynamic store per packed batch -------------------------
        for bp in range(BP):
            slot = slot_ref[blk * BP + bp, s]

            @pl.when(slot >= 0)
            def _store(bp=bp, slot=slot):
                out_ref[pl.ds(slot, 1), bp * C:(bp + 1) * C, :] = (
                    x_new[None, bp * C:(bp + 1) * C, :].astype(out_ref.dtype))

        return x_new

    unroll = n_steps if n_steps <= 8 else 4
    jax.lax.fori_loop(0, n_steps, step, x_ref[...], unroll=unroll)


@functools.partial(jax.jit,
                   static_argnames=("n_steps", "propagate_time", "activation",
                                    "roll_matches_jnp"))
def nca2d_forward(x, acquire_at_step, params, *, n_steps, propagate_time, activation,
                  roll_matches_jnp=True):
    """Mirrors NCA2D.forward (replace_by_targets=False, fire_rate=1). x: (B, H, W, C)."""
    B, H, W, C = x.shape
    T = acquire_at_step.shape[1]
    HW = H * W
    hidden = params['fc0_w'].shape[0]

    # Batch packing: fill 8 f32 sublanes (C=4 -> 2 batches/block) but keep >= 2 grid blocks so
    # both v7x TensorCores get work (falls back to 1 batch/block for B == 2).
    BP = 2 if (B % 2 == 0 and B // 2 >= 2) else 1
    BPC, BPH = BP * C, BP * hidden

    # ---- inverted acquire table: slot_tab[b, s] = t (written slot) or -1 --------------------
    acq = acquire_at_step.astype(jnp.int32)
    valid = (acq > 0) & (acq < n_steps)                 # torch: only step in [1, n_steps) fires
    s_idx = jnp.where(valid, acq, n_steps)              # invalid -> OOB, dropped by the scatter
    t_idx = jnp.broadcast_to(jnp.arange(T, dtype=jnp.int32)[None, :], (B, T))
    slot_tab = jnp.full((B, n_steps), -1, jnp.int32).at[
        jnp.arange(B, dtype=jnp.int32)[:, None], s_idx].set(t_idx, mode="drop")

    # ---- kernel-layout weights ---------------------------------------------------------------
    # The module transposes (1,-1) around the convs (swaps the spatial axes the conv sees);
    # fold that in by transposing the taps: w_k[c, (dr+1)*3+(dc+1)] = w_torch[c, 0, dc+1, dr+1].
    w0_k = jnp.transpose(params['w0'][:, 0], (0, 2, 1)).reshape(C, 9)
    w1_k = jnp.transpose(params['w1'][:, 0], (0, 2, 1)).reshape(C, 9)
    w0_bd = jnp.tile(w0_k, (BP, 1))
    w1_bd = jnp.tile(w1_k, (BP, 1))
    fc0_w, fc0_b = params['fc0_w'], params['fc0_b']
    Wx, Wz1, Wz2 = fc0_w[:, 0:C], fc0_w[:, C:2 * C], fc0_w[:, 2 * C:3 * C]
    bias_col = fc0_b + Wz1 @ params['b0'] + Wz2 @ params['b1']      # conv biases fold into fc0
    time_col = fc0_w[:, 3 * C] if propagate_time else jnp.zeros((hidden,), jnp.float32)
    eye = jnp.eye(BP, dtype=jnp.float32)
    wx_bd = jnp.kron(eye, Wx)                          # block-diag so packed batches don't mix
    wz1_bd = jnp.kron(eye, Wz1)
    wz2_bd = jnp.kron(eye, Wz2)
    fc1_bd = jnp.kron(eye, params['fc1_w'])
    bias_bd = jnp.tile(bias_col, BP)[:, None]
    time_bd = jnp.tile(time_col, BP)[:, None]

    # channel-major, lane-dense pixels; BP consecutive batches stacked on the sublane axis
    x_st = jnp.transpose(x, (0, 3, 1, 2)).reshape(B // BP, BPC, HW).astype(jnp.float32)

    kernel = functools.partial(_nca_kernel, C=C, H=H, W=W, BP=BP, n_steps=n_steps,
                               activation=activation, propagate_time=propagate_time,
                               roll_matches_jnp=roll_matches_jnp)
    out = pl.pallas_call(
        kernel,
        grid_spec=pltpu.PrefetchScalarGridSpec(
            num_scalar_prefetch=0,
            grid=(B // BP,),
            in_specs=[
                pl.BlockSpec(memory_space=pltpu.MemorySpace.SMEM),       # slot table (B, n_steps)
                pl.BlockSpec((None, BPC, HW), lambda b: (b, 0, 0)),      # x (stacked)
                pl.BlockSpec((BPC, 9), lambda b: (0, 0)),                # p0 taps
                pl.BlockSpec((BPC, 9), lambda b: (0, 0)),                # p1 taps
                pl.BlockSpec((BPH, BPC), lambda b: (0, 0)),              # Wx
                pl.BlockSpec((BPH, BPC), lambda b: (0, 0)),              # Wz1
                pl.BlockSpec((BPH, BPC), lambda b: (0, 0)),              # Wz2
                pl.BlockSpec((BPC, BPH), lambda b: (0, 0)),              # fc1
                pl.BlockSpec((BPH, 1), lambda b: (0, 0)),                # bias column
                pl.BlockSpec((BPH, 1), lambda b: (0, 0)),                # time column
            ],
            out_specs=pl.BlockSpec((None, T, BPC, HW), lambda b: (b, 0, 0, 0)),
        ),
        out_shape=jax.ShapeDtypeStruct((B // BP, T, BPC, HW), jnp.float32),
        compiler_params=pltpu.CompilerParams(dimension_semantics=("parallel",)),
    )(slot_tab, x_st, w0_bd, w1_bd, wx_bd, wz1_bd, wz2_bd, fc1_bd, bias_bd, time_bd)

    # Un-pack batches, then resolve acquire slots: gather each (b, t) from the canonical slot the
    # kernel wrote for its step (handles duplicate acquire steps) and zero never-written slots
    # (acq == 0 or acq >= n_steps).  This replaces the in-kernel full-output zero-init.
    out = out.reshape(B // BP, T, BP, C, HW)
    out = jnp.moveaxis(out, 2, 1).reshape(B, T, C, HW)
    rep = slot_tab[jnp.arange(B)[:, None], jnp.clip(acq, 0, n_steps - 1)]      # (B, T)
    out = out[jnp.arange(B)[:, None], jnp.clip(rep, 0, T - 1)]                 # (B, T, C, HW)
    out = jnp.where(valid[:, :, None, None], out, 0.0)
    # TODO(synk): replace_by_targets branch uses host np.random + target substitution; not ported.
    return jnp.transpose(out.reshape(B, T, C, H, W), (0, 1, 3, 4, 2)).astype(x.dtype)


def _roll_direction_matches_jnp():
    """One-off probe: does pltpu.roll follow jnp.roll's shift sign? (direction-proofs the kernel)."""
    def _k(x_ref, o_ref):
        o_ref[...] = pltpu.roll(x_ref[...], 1, axis=1)
    x = jnp.broadcast_to(jnp.arange(256, dtype=jnp.float32)[None, :], (8, 256))
    y = pl.pallas_call(_k, out_shape=jax.ShapeDtypeStruct((8, 256), jnp.float32))(x)
    return bool(float(y[0, 0]) == 255.0)


def init_params(key, channel_n, hidden_size, propagate_time, activation):
    """Raw torch-layout parameters with torch default inits."""
    C, k = channel_n, 3
    ks = jax.random.split(key, 7)
    s_conv = 1.0 / np.sqrt(k * k)
    w0 = jax.random.uniform(ks[0], (C, 1, k, k), jnp.float32, -s_conv, s_conv)
    b0 = jax.random.uniform(ks[1], (C,), jnp.float32, -s_conv, s_conv)
    w1 = jax.random.uniform(ks[2], (C, 1, k, k), jnp.float32, -s_conv, s_conv)
    b1 = jax.random.uniform(ks[3], (C,), jnp.float32, -s_conv, s_conv)
    fc0in = 3 * C + (1 if propagate_time else 0)
    s0 = 1.0 / np.sqrt(fc0in)
    fc0_w = jax.random.uniform(ks[4], (hidden_size, fc0in), jnp.float32, -s0, s0)
    fc0_b = jax.random.uniform(ks[5], (hidden_size,), jnp.float32, -s0, s0)
    s1 = 1.0 / np.sqrt(hidden_size)
    fc1_w = (jax.random.uniform(ks[6], (C, hidden_size), jnp.float32, -s1, s1)
             if activation else jnp.zeros((C, hidden_size), jnp.float32))
    return dict(w0=w0, b0=b0, w1=w1, b1=b1, fc0_w=fc0_w, fc0_b=fc0_b, fc1_w=fc1_w)


def nca2d_reference(x, acquire_at_step, params, *, n_steps, propagate_time, activation):
    """Pure-JAX mirror of the PyTorch forward (replace_by_targets=False, fire_rate=1)."""
    B, H, W, C = x.shape
    T = acquire_at_step.shape[1]
    hp = jax.lax.Precision.HIGHEST
    data = jnp.zeros((B, T, H, W, C), jnp.float32)

    def dwconv(xt, w, b):                                   # xt: (B, C, Ws, Hs), torch-style
        xp = jnp.pad(xt, ((0, 0), (0, 0), (1, 1), (1, 1)), mode="reflect")
        z = jnp.zeros_like(xt)
        for a in range(3):
            for bb in range(3):
                z = z + xp[:, :, a:a + xt.shape[2], bb:bb + xt.shape[3]] * \
                    w[:, 0, a, bb][None, :, None, None]
        return z + b[None, :, None, None]

    for step in range(n_steps):
        xt = jnp.swapaxes(x, 1, -1)                         # (B, C, W, H)  == x.transpose(1,-1)
        z1 = dwconv(xt, params['w0'], params['b0'])
        z2 = dwconv(xt, params['w1'], params['b1'])
        dx = jnp.swapaxes(jnp.concatenate([xt, z1, z2], axis=1), 1, -1)   # (B, H, W, 3C)
        if propagate_time:
            prog = jnp.full((*dx.shape[:-1], 1), step / n_steps, dx.dtype)
            dx = jnp.concatenate([dx, prog], axis=-1)
        dx = jnp.dot(dx, params['fc0_w'].T, precision=hp) + params['fc0_b']
        dx = jax.nn.relu(dx)
        dx = jnp.dot(dx, params['fc1_w'].T, precision=hp)
        if activation == 'sigmoid':
            dx = jax.nn.sigmoid(dx)
        x = x + dx
        if step > 0:
            hit = (acquire_at_step == step)
            data = jnp.where(hit[:, :, None, None, None], x[:, None], data)
    return data


if __name__ == "__main__":
    key = jax.random.PRNGKey(0)
    roll_jnp = _roll_direction_matches_jnp()

    H, Wd, C, hidden = 16, 16, 4, 32
    configs = [
        # B=2 -> 1 batch/block (keeps 2 grid blocks for v7x), propagate_time on, acq==0 edge case
        dict(B=2, n_steps=6, propagate_time=True, activation='sigmoid',
             acq=jnp.array([[2, 3, 5], [0, 4, 5]], dtype=jnp.int32)),
        # B=4 -> 2 batches/block (8 sublanes filled), no time input, duplicate acquire steps
        dict(B=4, n_steps=8, propagate_time=False, activation='sigmoid',
             acq=jnp.array([[1, 1, 7], [2, 4, 6], [3, 3, 3], [5, 6, 7]], dtype=jnp.int32)),
    ]

    for cfg in configs:
        key, kp, kx = jax.random.split(key, 3)
        params = init_params(kp, C, hidden, cfg['propagate_time'], cfg['activation'])
        x = jax.random.normal(kx, (cfg['B'], H, Wd, C), jnp.float32)
        out = nca2d_forward(x, cfg['acq'], params, n_steps=cfg['n_steps'],
                            propagate_time=cfg['propagate_time'],
                            activation=cfg['activation'], roll_matches_jnp=roll_jnp)
        out = jax.block_until_ready(out)
        T = cfg['acq'].shape[1]
        assert out.shape == (cfg['B'], T, H, Wd, C)
        ref = nca2d_reference(x, cfg['acq'], params, n_steps=cfg['n_steps'],
                              propagate_time=cfg['propagate_time'],
                              activation=cfg['activation'])
        np.testing.assert_allclose(np.asarray(out), np.asarray(ref), atol=2e-2, rtol=2e-2)

    print("KERNEL_OK")
</pallas_src>

<mosaic_0001>
module attributes {stable_mosaic.version = 11 : i64} {
  func.func @_k(%arg0: memref<8x256xf32, #tpu.memory_space<vmem>>, %arg1: memref<8x256xf32, #tpu.memory_space<vmem>>) attributes {dimension_semantics = [], scalar_prefetch = 0 : i64, scratch_operands = 0 : i64, tpu.core_type = #tpu.core_type<tc>} {
    %c0 = arith.constant 0 : index
    %c0_0 = arith.constant 0 : index
    %0 = vector.load %arg0[%c0, %c0_0] : memref<8x256xf32, #tpu.memory_space<vmem>>, vector<8x256xf32>
    %c1_i32 = arith.constant 1 : i32
    %1 = tpu.dynamic_rotate %0 by %c1_i32 dim 1 : vector<8x256xf32>, i32 -> vector<8x256xf32>
    %c0_1 = arith.constant 0 : index
    %c0_2 = arith.constant 0 : index
    %2 = vector.load %arg1[%c0_1, %c0_2] : memref<8x256xf32, #tpu.memory_space<vmem>>, vector<8x256xf32>
    tpu.vector_store %arg1[%c0_1, %c0_2], %1 {strides = array<i32>} : memref<8x256xf32, #tpu.memory_space<vmem>>, vector<8x256xf32>,
    return
  }
}

</mosaic_0001>

<bundles_post_ra>
// kernel: tpu_custom_call.1
= control target key start
LH: loop header
LB: loop body
LE: loop exit
PB: predicated region body
PF: predicated region fallthrough
CT: control target
= control target key end

     0   :  { %6 = vsyncpa [#allocation3], 0  ;;  %s137_s0 = inlined_call_operand.hbm [shape: f32[8,256], index: 0, kind: input, shape index: {}]   ;;  %s138_s1 = inlined_call_operand.hbm [shape: f32[8,256], index: 1, kind: output, shape index: {}]  }
   0x1   :  { %7 = vsyncpa [#allocation4], 0  ;;  %s100_s6 = smov [#allocation2]   ;;  %s52_s10 = scalar_lea.hbm %s137_s0, 256 }
   0x2   :  { %s14_s7 = sshll.u32 %s100_s6, 4  ;;  %p53_p0 = scmp.ne.s32.totalorder %s137_s0, %s52_s10  ;;  %s15_s7 = int_to_ptr.vmem [resolvable:$true] %s14_s7 }
   0x3   :  { %p56_p1 = scmp.lt.u32.totalorder %s52_s10, %s137_s0 }
   0x5   :  { %p58_p2 = pnand %p56_p1, %p53_p0 }
   0x7   :  { %61 = shalt.err (!%p58_p2)
}
   0x8   :  { %s62_s15 = scalar_lea.vmem %s15_s7, 256  ;;  %p67_p4 = scmp.lt.s32.totalorder %s15_s7, %s15_s7 }
   0x9   :  { %p63_p3 = scmp.ne.s32.totalorder %s15_s7, %s62_s15  ;;  %p68_p5 = scmp.lt.s32.totalorder %s62_s15, %s62_s15 }
   0xb   :  { %p69_p6 = por %p68_p5, %p67_p4 }
   0xd   :  { %p70_p7 = pnand %p69_p6, %p63_p3 }
   0xf   :  { %73 = shalt.err (!%p70_p7)
}
  0x10   :  { %17 = dma.hbm_to_vmem [thread:$0]  %s137_s0, 256, %s15_s7, [#allocation3]  }
  0x11   :  { %96 = dma.done.wait [#allocation3], 256  }
  0x12   :  { %97 = vsyncadd [#allocation3], 4294967040  ;;  %v21_v0 = vld [vmem:[#allocation2] sm:$0xff]  ;;  %s101_s18 = smov 1   ;;  %v22_v1 = vld [vmem:[#allocation2 + $0x8] sm:$0xff]  ;;  %v27_v2 = vlaneseq  ;;  %s102_s19 = smov [#allocation5]  }
  0x13   :  { %23 = vrot.lane.b32.xlu0 %v21_v0, %s101_s18  ;;  %s40_s20 = sshll.u32 %s102_s19, 4  ;;  %s41_s20 = int_to_ptr.vmem [resolvable:$true] %s40_s20 }
  0x14   :  { %v28_v3 = vand.u32 127, %v27_v2  ;;  %s74_s0 = scalar_lea.vmem %s41_s20, 256  ;;  %p79_p9 = scmp.lt.s32.totalorder %s41_s20, %s41_s20 }
  0x15   :  { %p75_p8 = scmp.ne.s32.totalorder %s41_s20, %s74_s0  ;;  %p80_p10 = scmp.lt.s32.totalorder %s74_s0, %s74_s0 }
  0x16   :  { %vm29_vm0 = vcmp.lt.s32.totalorder %v28_v3, 1 }
  0x17   :  { %25 = vrot.lane.b32.xlu0 %v22_v1, %s101_s18  ;;  %p81_p11 = por %p80_p10, %p79_p9 }
  0x19   :  { %p82_p12 = pnand %p81_p11, %p75_p8 }
  0x85   :  { %v24_v4 = vpop.permute.xlu0 %23 }
  0x89   :  { %v26_v5 = vpop.permute.xlu0 %25 }
  0x8a   :  { %v30_v6 = vsel %vm29_vm0, %v24_v4, %v26_v5  ;;  %v31_v7 = vsel %vm29_vm0, %v26_v5, %v24_v4 }
  0x8b   :  { %32 = vst [vmem:[#allocation5] sm:$0xff] %v31_v7  ;;  %33 = vst [vmem:[#allocation5 + $0x8] sm:$0xff] %v30_v6 }
  0x8c   :  { %85 = shalt.err (!%p82_p12)
}
  0x8d   :  { %s86_s23 = scalar_lea.hbm %s138_s1, 256 }
  0x8e   :  { %p87_p13 = scmp.ne.s32.totalorder %s138_s1, %s86_s23  ;;  %p90_p0 = scmp.lt.u32.totalorder %s86_s23, %s138_s1 }
  0x90   :  { %p92_p1 = pnand %p90_p0, %p87_p13 }
  0x92   :  { %95 = shalt.err (!%p92_p1)
}
  0x93   :  { %43 = dma.vmem_to_hbm [thread:$0]  %s41_s20, 256, %s138_s1, [#allocation4]  }
  0x94   :  { %98 = dma.done.wait [#allocation4], 256  }
  0x95   :  { %99 = vsyncadd [#allocation4], 4294967040 }
  0x96   :  { %47 = vsyncpa [#allocation3], 1 }
  0x97   :  { %48 = vsyncpa [#allocation4], 1 }

</bundles_post_ra>
